<compile_context>
chip_gen: v5e
topology: v5e:2x2
jax: 0.10.0
libtpu: 0.0.40
codegen_flags: <defaults>
</compile_context>

<pallas_src>
import functools

import jax
import jax.numpy as jnp
from jax.experimental import pallas as pl
from jax.experimental.pallas import tpu as pltpu

LANE = 128


def _round_up(n, m):
    return ((n + m - 1) // m) * m


def _choose_block_m(batch):
    """Batch-tile selection:
       - single tile for small batches,
       - >= 2 grid steps for medium batches (keeps both v7x TensorCores busy),
       - 512-row tiles (multiple of 256, fills v6e/v7x MXU rows) for large batches.
       VMEM footprint stays a few MiB even at 512 — far below every generation's limit."""
    pb = _round_up(batch, 8)
    if pb <= 256:
        return pb
    if pb < 1024:
        return _round_up((pb + 1) // 2, 8)
    return 512


def mlp_kernel(alpha_ref,                       # SMEM (4,) f32 : PReLU slopes
               x_ref,                           # VMEM (BM, in)           bf16
               w1_ref, b1_ref,                  # (in, 512)  bf16, (1, 512)  f32
               w2_ref, b2_ref,                  # (512, 256) bf16, (1, 256)  f32
               w3_ref, b3_ref,                  # (256, 128) bf16, (1, 128)  f32
               w4_ref, b4_ref,                  # (128, 128p) bf16, (1, 128p) f32
               w5_ref, b5_ref,                  # (128p, out) bf16, (1, out)  f32
               o_ref):                          # VMEM (BM, out) bf16
    # Hoist the scalar slope reads out of the matmul chain.
    a0 = alpha_ref[0]
    a1 = alpha_ref[1]
    a2 = alpha_ref[2]
    a3 = alpha_ref[3]

    def prelu(h, a):
        # PyTorch nn.PReLU(num_parameters=1): f(x) = x if x >= 0 else a * x
        return jnp.where(h >= 0.0, h, a * h)

    def dense(h_bf16, w_ref, b_ref):
        # bf16 MXU inputs, f32 accumulation, f32 bias add.
        return jnp.dot(h_bf16, w_ref[...],
                       preferred_element_type=jnp.float32) + b_ref[...]

    h = dense(x_ref[...], w1_ref, b1_ref)
    h = prelu(h, a0)                            # Dropout -> identity (eval)
    h = dense(h.astype(jnp.bfloat16), w2_ref, b2_ref)
    h = prelu(h, a1)                            # Dropout -> identity (eval)
    h = dense(h.astype(jnp.bfloat16), w3_ref, b3_ref)
    h = prelu(h, a2)                            # Dropout -> identity (eval)
    h = dense(h.astype(jnp.bfloat16), w4_ref, b4_ref)
    h = prelu(h, a3)
    h = dense(h.astype(jnp.bfloat16), w5_ref, b5_ref)

    o_ref[...] = h.astype(o_ref.dtype)


def init_params(key, input_size, output_size):
    """Deterministic parameter init (PyTorch-Linear-style uniform bounds), f32."""
    dims = [input_size, 512, 256, 128, 64, output_size]
    params = []
    for i in range(5):
        fan_in, fan_out = dims[i], dims[i + 1]
        key, kw, kb = jax.random.split(key, 3)
        bound = 1.0 / jnp.sqrt(jnp.float32(fan_in))
        # stored as (in, out): already transposed relative to torch's (out, in)
        w = jax.random.uniform(kw, (fan_in, fan_out), jnp.float32, -bound, bound)
        b = jax.random.uniform(kb, (1, fan_out), jnp.float32, -bound, bound)
        params.append((w, b))
    # nn.PReLU() default init: single slope = 0.25, one per PReLU (4 of them)
    alphas = jnp.full((4,), 0.25, dtype=jnp.float32)
    return params, alphas


def preprocess_params(params):
    """Zero-pad the hidden widths (layers 1..4) up to a multiple of 128 lanes (and the
    matching next-layer input rows) so every intermediate is lane-dense; the final layer
    output is left at its true width (tiny) to avoid writing 16x padded zeros to HBM.
    Weights are cast to bfloat16 for the MXU. Zero padding is numerically exact."""
    n = len(params)
    in0 = params[0][0].shape[0]
    widths = [w.shape[1] for w, _ in params]
    padded = [in0] + [_round_up(d, LANE) for d in widths[:-1]] + [widths[-1]]
    out = []
    for i, (w, b) in enumerate(params):
        in_d, out_d = w.shape
        in_p, out_p = padded[i], padded[i + 1]
        w_p = jnp.zeros((in_p, out_p), jnp.float32).at[:in_d, :out_d].set(w)
        b_p = jnp.zeros((1, out_p), jnp.float32).at[:, :out_d].set(b)
        out.append((w_p.astype(jnp.bfloat16), b_p))
    return out


@functools.partial(jax.jit, static_argnames=("block_m",))
def mlp_forward(x, padded_params, alphas, *, block_m=None):
    batch, in_features = x.shape
    out_features = padded_params[-1][0].shape[1]

    if block_m is None:
        block_m = _choose_block_m(batch)
    block_m = max(8, _round_up(block_m, 8))

    # Pad the batch only if needed (avoids an extra HBM pass for aligned batches).
    padded_batch = _round_up(batch, block_m)
    x_bf = x.astype(jnp.bfloat16)
    if padded_batch != batch:
        x_bf = jnp.pad(x_bf, ((0, padded_batch - batch), (0, 0)))

    grid = (padded_batch // block_m,)

    in_specs = [
        pl.BlockSpec(memory_space=pltpu.MemorySpace.SMEM),              # alphas
        pl.BlockSpec((block_m, in_features), lambda i: (i, 0)),         # x tile
    ]
    for w, b in padded_params:
        # Constant block index -> weights/biases stay resident in VMEM across steps.
        in_specs.append(pl.BlockSpec(w.shape, lambda i: (0, 0)))
        in_specs.append(pl.BlockSpec(b.shape, lambda i: (0, 0)))
    out_specs = pl.BlockSpec((block_m, out_features), lambda i: (i, 0))

    flops = 2 * padded_batch * sum(w.shape[0] * w.shape[1] for w, _ in padded_params)
    bytes_accessed = (x_bf.size * 2                                     # bf16 x
                      + sum(w.size * 2 + b.size * 4 for w, b in padded_params)
                      + padded_batch * out_features * 2)                # bf16 out

    flat_args = [alphas, x_bf]
    for w, b in padded_params:
        flat_args.extend([w, b])

    out_padded = pl.pallas_call(
        mlp_kernel,
        out_shape=jax.ShapeDtypeStruct((padded_batch, out_features), jnp.bfloat16),
        grid=grid,
        in_specs=in_specs,
        out_specs=out_specs,
        compiler_params=pltpu.CompilerParams(
            dimension_semantics=("parallel",)),
        cost_estimate=pl.CostEstimate(flops=flops, transcendentals=0,
                                      bytes_accessed=bytes_accessed),
    )(*flat_args)

    # Slice off batch padding only; the feature dim is already the true output width.
    return out_padded[:batch, :]


def mlp_reference(x, params, alphas):
    """Pure-JAX reference with the same bf16-input / f32-accumulation semantics."""
    h = x.astype(jnp.bfloat16)
    n = len(params)
    for i, (w, b) in enumerate(params):
        h = jnp.dot(h, w.astype(jnp.bfloat16),
                    preferred_element_type=jnp.float32) + b
        if i < n - 1:                      # PReLU after the first 4 linears only
            h = jnp.where(h >= 0, h, alphas[i] * h)
            h = h.astype(jnp.bfloat16)
    return h


if __name__ == "__main__":
    input_size, output_size, batch = 32, 8, 8

    key = jax.random.PRNGKey(0)
    key, kx = jax.random.split(key)
    params, alphas = init_params(key, input_size, output_size)
    padded_params = preprocess_params(params)
    x = jax.random.normal(kx, (batch, input_size), dtype=jnp.float32)

    out = mlp_forward(x, padded_params, alphas)
    out = jax.block_until_ready(out)

    ref = mlp_reference(x, params, alphas)
    assert out.shape == (batch, output_size)
    out_f32 = out.astype(jnp.float32)
    max_diff = jnp.max(jnp.abs(out_f32 - ref))
    assert jnp.allclose(out_f32, ref, atol=2e-2, rtol=2e-2), (
        f"mismatch vs reference, max abs diff = {max_diff}")

    print("KERNEL_OK")
</pallas_src>

<mosaic_0001>
module attributes {stable_mosaic.version = 11 : i64} {
  func.func @mlp_kernel(%arg0: i32, %arg1: memref<4xf32, #tpu.memory_space<smem>>, %arg2: memref<8x32xbf16, #tpu.memory_space<vmem>>, %arg3: memref<32x512xbf16, #tpu.memory_space<vmem>>, %arg4: memref<1x512xf32, #tpu.memory_space<vmem>>, %arg5: memref<512x256xbf16, #tpu.memory_space<vmem>>, %arg6: memref<1x256xf32, #tpu.memory_space<vmem>>, %arg7: memref<256x128xbf16, #tpu.memory_space<vmem>>, %arg8: memref<1x128xf32, #tpu.memory_space<vmem>>, %arg9: memref<128x128xbf16, #tpu.memory_space<vmem>>, %arg10: memref<1x128xf32, #tpu.memory_space<vmem>>, %arg11: memref<128x8xbf16, #tpu.memory_space<vmem>>, %arg12: memref<1x8xf32, #tpu.memory_space<vmem>>, %arg13: memref<8x8xbf16, #tpu.memory_space<vmem>>) attributes {dimension_semantics = [#tpu.dimension_semantics<parallel>], iteration_bounds = array<i64: 1>, scalar_prefetch = 0 : i64, scratch_operands = 0 : i64, tpu.core_type = #tpu.core_type<tc>, window_params = [{transform_indices = @transform_0, window_bounds = array<i64: 4>}, {transform_indices = @transform_1, window_bounds = array<i64: 8, 32>}, {pipeline_mode = #tpu.pipeline_mode<synchronous>, transform_indices = @transform_2, window_bounds = array<i64: 32, 512>}, {pipeline_mode = #tpu.pipeline_mode<synchronous>, transform_indices = @transform_3, window_bounds = array<i64: 1, 512>}, {pipeline_mode = #tpu.pipeline_mode<synchronous>, transform_indices = @transform_4, window_bounds = array<i64: 512, 256>}, {pipeline_mode = #tpu.pipeline_mode<synchronous>, transform_indices = @transform_5, window_bounds = array<i64: 1, 256>}, {pipeline_mode = #tpu.pipeline_mode<synchronous>, transform_indices = @transform_6, window_bounds = array<i64: 256, 128>}, {pipeline_mode = #tpu.pipeline_mode<synchronous>, transform_indices = @transform_7, window_bounds = array<i64: 1, 128>}, {pipeline_mode = #tpu.pipeline_mode<synchronous>, transform_indices = @transform_8, window_bounds = array<i64: 128, 128>}, {pipeline_mode = #tpu.pipeline_mode<synchronous>, transform_indices = @transform_9, window_bounds = array<i64: 1, 128>}, {pipeline_mode = #tpu.pipeline_mode<synchronous>, transform_indices = @transform_10, window_bounds = array<i64: 128, 8>}, {pipeline_mode = #tpu.pipeline_mode<synchronous>, transform_indices = @transform_11, window_bounds = array<i64: 1, 8>}, {transform_indices = @transform_12, window_bounds = array<i64: 8, 8>}]} {
    %c0 = arith.constant 0 : index
    %0 = memref.load %arg1[%c0] : memref<4xf32, #tpu.memory_space<smem>>
    %c1 = arith.constant 1 : index
    %1 = memref.load %arg1[%c1] : memref<4xf32, #tpu.memory_space<smem>>
    %c2 = arith.constant 2 : index
    %2 = memref.load %arg1[%c2] : memref<4xf32, #tpu.memory_space<smem>>
    %c3 = arith.constant 3 : index
    %3 = memref.load %arg1[%c3] : memref<4xf32, #tpu.memory_space<smem>>
    %c0_0 = arith.constant 0 : index
    %c0_1 = arith.constant 0 : index
    %4 = vector.load %arg2[%c0_0, %c0_1] : memref<8x32xbf16, #tpu.memory_space<vmem>>, vector<8x32xbf16>
    %c0_2 = arith.constant 0 : index
    %c0_3 = arith.constant 0 : index
    %5 = vector.load %arg3[%c0_2, %c0_3] : memref<32x512xbf16, #tpu.memory_space<vmem>>, vector<32x512xbf16>
    %cst = arith.constant dense<0.000000e+00> : vector<8x512xf32>
    %6 = tpu.matmul %4, %5, %cst {dimension_numbers = #tpu.dot_dimension_numbers<[1], [0], [0], [1], [0, 0, 1, 1], [], []>} : vector<8x32xbf16>, vector<32x512xbf16>, vector<8x512xf32> -> vector<8x512xf32>
    %c0_4 = arith.constant 0 : index
    %c0_5 = arith.constant 0 : index
    %7 = vector.load %arg4[%c0_4, %c0_5] : memref<1x512xf32, #tpu.memory_space<vmem>>, vector<1x512xf32>
    %8 = vector.broadcast %7 : vector<1x512xf32> to vector<8x512xf32>
    %9 = arith.addf %6, %8 : vector<8x512xf32>
    %cst_6 = arith.constant 0.000000e+00 : f32
    %10 = vector.broadcast %cst_6 : f32 to vector<8x512xf32>
    %11 = arith.cmpf oge, %9, %10 : vector<8x512xf32>
    %12 = vector.broadcast %0 : f32 to vector<8x512xf32>
    %13 = arith.mulf %12, %9 : vector<8x512xf32>
    %14 = arith.select %11, %9, %13 : vector<8x512xi1>, vector<8x512xf32>
    %15 = arith.truncf %14 : vector<8x512xf32> to vector<8x512xbf16>
    %c0_7 = arith.constant 0 : index
    %c0_8 = arith.constant 0 : index
    %16 = vector.load %arg5[%c0_7, %c0_8] : memref<512x256xbf16, #tpu.memory_space<vmem>>, vector<512x256xbf16>
    %cst_9 = arith.constant dense<0.000000e+00> : vector<8x256xf32>
    %17 = tpu.matmul %15, %16, %cst_9 {dimension_numbers = #tpu.dot_dimension_numbers<[1], [0], [0], [1], [0, 0, 1, 1], [], []>} : vector<8x512xbf16>, vector<512x256xbf16>, vector<8x256xf32> -> vector<8x256xf32>
    %c0_10 = arith.constant 0 : index
    %c0_11 = arith.constant 0 : index
    %18 = vector.load %arg6[%c0_10, %c0_11] : memref<1x256xf32, #tpu.memory_space<vmem>>, vector<1x256xf32>
    %19 = vector.broadcast %18 : vector<1x256xf32> to vector<8x256xf32>
    %20 = arith.addf %17, %19 : vector<8x256xf32>
    %cst_12 = arith.constant 0.000000e+00 : f32
    %21 = vector.broadcast %cst_12 : f32 to vector<8x256xf32>
    %22 = arith.cmpf oge, %20, %21 : vector<8x256xf32>
    %23 = vector.broadcast %1 : f32 to vector<8x256xf32>
    %24 = arith.mulf %23, %20 : vector<8x256xf32>
    %25 = arith.select %22, %20, %24 : vector<8x256xi1>, vector<8x256xf32>
    %26 = arith.truncf %25 : vector<8x256xf32> to vector<8x256xbf16>
    %c0_13 = arith.constant 0 : index
    %c0_14 = arith.constant 0 : index
    %27 = vector.load %arg7[%c0_13, %c0_14] : memref<256x128xbf16, #tpu.memory_space<vmem>>, vector<256x128xbf16>
    %cst_15 = arith.constant dense<0.000000e+00> : vector<8x128xf32>
    %28 = tpu.matmul %26, %27, %cst_15 {dimension_numbers = #tpu.dot_dimension_numbers<[1], [0], [0], [1], [0, 0, 1, 1], [], []>} : vector<8x256xbf16>, vector<256x128xbf16>, vector<8x128xf32> -> vector<8x128xf32>
    %c0_16 = arith.constant 0 : index
    %c0_17 = arith.constant 0 : index
    %29 = vector.load %arg8[%c0_16, %c0_17] : memref<1x128xf32, #tpu.memory_space<vmem>>, vector<1x128xf32>
    %30 = vector.broadcast %29 : vector<1x128xf32> to vector<8x128xf32>
    %31 = arith.addf %28, %30 : vector<8x128xf32>
    %cst_18 = arith.constant 0.000000e+00 : f32
    %32 = vector.broadcast %cst_18 : f32 to vector<8x128xf32>
    %33 = arith.cmpf oge, %31, %32 : vector<8x128xf32>
    %34 = vector.broadcast %2 : f32 to vector<8x128xf32>
    %35 = arith.mulf %34, %31 : vector<8x128xf32>
    %36 = arith.select %33, %31, %35 : vector<8x128xi1>, vector<8x128xf32>
    %37 = arith.truncf %36 : vector<8x128xf32> to vector<8x128xbf16>
    %c0_19 = arith.constant 0 : index
    %c0_20 = arith.constant 0 : index
    %38 = vector.load %arg9[%c0_19, %c0_20] : memref<128x128xbf16, #tpu.memory_space<vmem>>, vector<128x128xbf16>
    %cst_21 = arith.constant dense<0.000000e+00> : vector<8x128xf32>
    %39 = tpu.matmul %37, %38, %cst_21 {dimension_numbers = #tpu.dot_dimension_numbers<[1], [0], [0], [1], [0, 0, 1, 1], [], []>} : vector<8x128xbf16>, vector<128x128xbf16>, vector<8x128xf32> -> vector<8x128xf32>
    %c0_22 = arith.constant 0 : index
    %c0_23 = arith.constant 0 : index
    %40 = vector.load %arg10[%c0_22, %c0_23] : memref<1x128xf32, #tpu.memory_space<vmem>>, vector<1x128xf32>
    %41 = vector.broadcast %40 : vector<1x128xf32> to vector<8x128xf32>
    %42 = arith.addf %39, %41 : vector<8x128xf32>
    %cst_24 = arith.constant 0.000000e+00 : f32
    %43 = vector.broadcast %cst_24 : f32 to vector<8x128xf32>
    %44 = arith.cmpf oge, %42, %43 : vector<8x128xf32>
    %45 = vector.broadcast %3 : f32 to vector<8x128xf32>
    %46 = arith.mulf %45, %42 : vector<8x128xf32>
    %47 = arith.select %44, %42, %46 : vector<8x128xi1>, vector<8x128xf32>
    %48 = arith.truncf %47 : vector<8x128xf32> to vector<8x128xbf16>
    %c0_25 = arith.constant 0 : index
    %c0_26 = arith.constant 0 : index
    %49 = vector.load %arg11[%c0_25, %c0_26] : memref<128x8xbf16, #tpu.memory_space<vmem>>, vector<128x8xbf16>
    %cst_27 = arith.constant dense<0.000000e+00> : vector<8x8xf32>
    %50 = tpu.matmul %48, %49, %cst_27 {dimension_numbers = #tpu.dot_dimension_numbers<[1], [0], [0], [1], [0, 0, 1, 1], [], []>} : vector<8x128xbf16>, vector<128x8xbf16>, vector<8x8xf32> -> vector<8x8xf32>
    %c0_28 = arith.constant 0 : index
    %c0_29 = arith.constant 0 : index
    %51 = vector.load %arg12[%c0_28, %c0_29] : memref<1x8xf32, #tpu.memory_space<vmem>>, vector<1x8xf32>
    %52 = vector.broadcast %51 : vector<1x8xf32> to vector<8x8xf32>
    %53 = arith.addf %50, %52 : vector<8x8xf32>
    %54 = arith.truncf %53 : vector<8x8xf32> to vector<8x8xbf16>
    %c0_30 = arith.constant 0 : index
    %c0_31 = arith.constant 0 : index
    %55 = vector.load %arg13[%c0_30, %c0_31] : memref<8x8xbf16, #tpu.memory_space<vmem>>, vector<8x8xbf16>
    tpu.vector_store %arg13[%c0_30, %c0_31], %54 {strides = array<i32>} : memref<8x8xbf16, #tpu.memory_space<vmem>>, vector<8x8xbf16>,
    return
  }
  func.func @transform_0(%arg0: i32) -> i32 {
    %c0_i32 = arith.constant 0 : i32
    %c0_i32_0 = arith.constant 0 : i32
    return %c0_i32 : i32
  }
  func.func @transform_1(%arg0: i32) -> (i32, i32) {
    %c0_i32 = arith.constant 0 : i32
    %c0_i32_0 = arith.constant 0 : i32
    return %arg0, %c0_i32 : i32, i32
  }
  func.func @transform_2(%arg0: i32) -> (i32, i32) {
    %c0_i32 = arith.constant 0 : i32
    %c0_i32_0 = arith.constant 0 : i32
    %c0_i32_1 = arith.constant 0 : i32
    return %c0_i32, %c0_i32_0 : i32, i32
  }
  func.func @transform_3(%arg0: i32) -> (i32, i32) {
    %c0_i32 = arith.constant 0 : i32
    %c0_i32_0 = arith.constant 0 : i32
    %c0_i32_1 = arith.constant 0 : i32
    return %c0_i32, %c0_i32_0 : i32, i32
  }
  func.func @transform_4(%arg0: i32) -> (i32, i32) {
    %c0_i32 = arith.constant 0 : i32
    %c0_i32_0 = arith.constant 0 : i32
    %c0_i32_1 = arith.constant 0 : i32
    return %c0_i32, %c0_i32_0 : i32, i32
  }
  func.func @transform_5(%arg0: i32) -> (i32, i32) {
    %c0_i32 = arith.constant 0 : i32
    %c0_i32_0 = arith.constant 0 : i32
    %c0_i32_1 = arith.constant 0 : i32
    return %c0_i32, %c0_i32_0 : i32, i32
  }
  func.func @transform_6(%arg0: i32) -> (i32, i32) {
    %c0_i32 = arith.constant 0 : i32
    %c0_i32_0 = arith.constant 0 : i32
    %c0_i32_1 = arith.constant 0 : i32
    return %c0_i32, %c0_i32_0 : i32, i32
  }
  func.func @transform_7(%arg0: i32) -> (i32, i32) {
    %c0_i32 = arith.constant 0 : i32
    %c0_i32_0 = arith.constant 0 : i32
    %c0_i32_1 = arith.constant 0 : i32
    return %c0_i32, %c0_i32_0 : i32, i32
  }
  func.func @transform_8(%arg0: i32) -> (i32, i32) {
    %c0_i32 = arith.constant 0 : i32
    %c0_i32_0 = arith.constant 0 : i32
    %c0_i32_1 = arith.constant 0 : i32
    return %c0_i32, %c0_i32_0 : i32, i32
  }
  func.func @transform_9(%arg0: i32) -> (i32, i32) {
    %c0_i32 = arith.constant 0 : i32
    %c0_i32_0 = arith.constant 0 : i32
    %c0_i32_1 = arith.constant 0 : i32
    return %c0_i32, %c0_i32_0 : i32, i32
  }
  func.func @transform_10(%arg0: i32) -> (i32, i32) {
    %c0_i32 = arith.constant 0 : i32
    %c0_i32_0 = arith.constant 0 : i32
    %c0_i32_1 = arith.constant 0 : i32
    return %c0_i32, %c0_i32_0 : i32, i32
  }
  func.func @transform_11(%arg0: i32) -> (i32, i32) {
    %c0_i32 = arith.constant 0 : i32
    %c0_i32_0 = arith.constant 0 : i32
    %c0_i32_1 = arith.constant 0 : i32
    return %c0_i32, %c0_i32_0 : i32, i32
  }
  func.func @transform_12(%arg0: i32) -> (i32, i32) {
    %c0_i32 = arith.constant 0 : i32
    %c0_i32_0 = arith.constant 0 : i32
    return %arg0, %c0_i32 : i32, i32
  }
}

</mosaic_0001>

<bundles_post_ra>
// kernel: mlp_forward.1
= control target key start
LH: loop header
LB: loop body
LE: loop exit
PB: predicated region body
PF: predicated region fallthrough
CT: control target
= control target key end

     0   :  { %17 = vsyncpa [#allocation5], 0  ;;  %s1935_s0 = inlined_call_operand.vmem [shape: f32[4], index: 0, kind: input, shape index: {}]   ;;  %s1936_s1 = inlined_call_operand.vmem [shape: bf16[8,32], index: 1, kind: input, shape index: {}]   ;;  %s1937_s2 = inlined_call_operand.vmem [shape: bf16[32,512], index: 2, kind: input, shape index: {}]   ;;  %s1938_s3 = inlined_call_operand.vmem [shape: f32[1,512], index: 3, kind: input, shape index: {}]   ;;  %s1939_s4 = inlined_call_operand.hbm [shape: bf16[512,256], index: 4, kind: input, shape index: {}]   ;;  %s1940_s5 = inlined_call_operand.vmem [shape: f32[1,256], index: 5, kind: input, shape index: {}]   ;;  %s1941_s6 = inlined_call_operand.hbm [shape: bf16[256,128], index: 6, kind: input, shape index: {}]   ;;  %s1942_s7 = inlined_call_operand.vmem [shape: f32[1,128], index: 7, kind: input, shape index: {}]   ;;  %s1943_s8 = inlined_call_operand.hbm [shape: bf16[128,128], index: 8, kind: input, shape index: {}]   ;;  %s1944_s9 = inlined_call_operand.vmem [shape: f32[1,128], index: 9, kind: input, shape index: {}]   ;;  %s1945_s10 = inlined_call_operand.vmem [shape: bf16[128,8], index: 10, kind: input, shape index: {}]   ;;  %s1946_s11 = inlined_call_operand.vmem [shape: f32[1,8], index: 11, kind: input, shape index: {}]   ;;  %s1947_s12 = inlined_call_operand.hbm [shape: bf16[8,8], index: 12, kind: output, shape index: {}]  }
   0x1   :  { %18 = vsyncpa [#allocation3], 0 }
   0x2   :  { %19 = vsyncpa [#allocation8], 0  ;;  %s55_s23 = sshll.u32 %s1941_s6, 4  ;;  %s56_s23 = int_to_ptr.hbm [resolvable:$true] %s55_s23 }
   0x3   :  { %20 = vsyncpa [#allocation4], 0  ;;  %s1749_s24 = smov [#allocation7]   ;;  %s26_s28 = sshll.u32 %s1935_s0, 4  ;;  %s27_s28 = int_to_ptr.vmem [resolvable:$true] %s26_s28 }
   0x4   :  { %s57_s25 = sshll.u32 %s1749_s24, 4  ;;  %s1750_s29 = smov 64   ;;  %s58_s25 = int_to_ptr.vmem [resolvable:$true] %s57_s25 }
   0x5   :  { %s1751_s30 = smov 4   ;;  %s1752_s13 = smov [#allocation2]  }
   0x6   :  { %63 = dma.hbm_to_vmem [thread:$0]  %s56_s23, 2048, %s58_s25, [#allocation8], %s1750_s29, %s1750_s29, %s1751_s30  }
   0x7   :  { %29 = dma.vmem_to_smem %s27_s28, 16, %s1752_s13, [#allocation5]  }
   0x8   :  { %s40_s16 = sshll.u32 %s1939_s4, 4  ;;  %s1753_s6 = smov [#allocation6]   ;;  %s41_s16 = int_to_ptr.hbm [resolvable:$true] %s40_s16 }
   0x9   :  { %s42_s17 = sshll.u32 %s1753_s6, 4  ;;  %s70_s20 = sshll.u32 %s1943_s8, 4  ;;  %s43_s17 = int_to_ptr.vmem [resolvable:$true] %s42_s17  ;;  %s71_s20 = int_to_ptr.hbm [resolvable:$true] %s70_s20 }
   0xa   :  { %s1754_s21 = smov 128   ;;  %s1755_s0 = smov 8  }
   0xb   :  { %48 = dma.hbm_to_vmem [thread:$0]  %s41_s16, 8192, %s43_s17, [#allocation3], %s1754_s21, %s1754_s21, %s1755_s0  }
   0xc   :  { %s1756_s22 = smov [#allocation9]  }
   0xd   :  { %s72_s23 = sshll.u32 %s1756_s22, 4  ;;  %s73_s23 = int_to_ptr.vmem [resolvable:$true] %s72_s23 }
   0xe   :  { %78 = dma.hbm_to_vmem [thread:$0]  %s71_s20, 1024, %s73_s23, [#allocation8], %s1750_s29, %s1750_s29, %s1751_s30  }
   0xf   :  { %1741 = dma.done.wait [#allocation5], 16  }
  0x10   :  { %1742 = vsyncadd [#allocation5], 4294967280 }
  0x11   :  { %1743 = dma.done.wait [#allocation3], 8192  }
  0x12   :  { %1744 = vsyncadd [#allocation3], 4294959104 }
  0x13   :  { %1745 = dma.done.wait [#allocation8], 3072  }
  0x14   :  { %1746 = vsyncadd [#allocation8], 4294964224 }
  0x15   :  { %101 = sfence }
  0x16   :  { %v1115_v0 = vld [vmem:[%s1937_s2 + $0x20] sm:$0xf]  ;;  %v1523_v1 = vld [vmem:[%s1937_s2 + $0x2c] sm:$0xf0]  ;;  %v1521_v2 = vld [vmem:[%s1937_s2 + $0x24] sm:$0xf] }
  0x17   :  { %v1116_v3 = vor.u32 %v1523_v1, %v1115_v0  ;;  %v1117_v4 = vld [vmem:[%s1937_s2 + $0x30] sm:$0xf0]  ;;  %v1123_v5 = vld [vmem:[%s1937_s2 + $0x28] sm:$0xf]  ;;  %v1524_v6 = vld [vmem:[%s1937_s2 + $0x34] sm:$0xf0] }
  0x18   :  { %v1120_v7 = vor.u32 %v1521_v2, %v1117_v4  ;;  %v1124_v8 = vor.u32 %v1524_v6, %v1123_v5  ;;  %v1522_v9 = vld [vmem:[%s1937_s2 + $0x2c] sm:$0xf]  ;;  %v1125_v10 = vld [vmem:[%s1937_s2 + $0x38] sm:$0xf0]  ;;  %v1099_v11 = vld [vmem:[%s1937_s2] sm:$0xf] }
  0x19   :  { %176 = vmatpush.bf16.msra.mxu0 %v1116_v3  ;;  %v1128_v12 = vor.u32 %v1522_v9, %v1125_v10  ;;  %v1519_v13 = vld [vmem:[%s1937_s2 + $0xc] sm:$0xf0]  ;;  %v1517_v14 = vld [vmem:[%s1937_s2 + $0x4] sm:$0xf]  ;;  %v1101_v15 = vld [vmem:[%s1937_s2 + $0x10] sm:$0xf0] }
  0x1a   :  { %189 = vmatpush.bf16.msra.mxu1 %v1120_v7  ;;  %202 = vmatpush.bf16.msra.mxu2 %v1124_v8  ;;  %v1100_v16 = vor.u32 %v1519_v13, %v1099_v11  ;;  %v1104_v17 = vor.u32 %v1517_v14, %v1101_v15  ;;  %v1107_v18 = vld [vmem:[%s1937_s2 + $0x8] sm:$0xf]  ;;  %v1520_v19 = vld [vmem:[%s1937_s2 + $0x14] sm:$0xf0]  ;;  %v1518_v20 = vld [vmem:[%s1937_s2 + $0xc] sm:$0xf] }
  0x1b   :  { %215 = vmatpush.bf16.msra.mxu3 %v1128_v12  ;;  %v1108_v21 = vor.u32 %v1520_v19, %v1107_v18  ;;  %v1109_v22 = vld [vmem:[%s1937_s2 + $0x18] sm:$0xf0]  ;;  %v107_v23 = vld [vmem:[%s1936_s1] sm:$0xf]  ;;  %vm166_vm0 = vcmask 261120   ;;  %s103_s1 = sld [smem:[#allocation2]] }
  0x1c   :  { %v1112_v24 = vor.u32 %v1518_v20, %v1109_v22  ;;  %v1191_v25 = vld [vmem:[#allocation6 + $0x70] sm:$0xf]  ;;  %v1540_v26 = vld [vmem:[#allocation6 + $0x74] sm:$0xf0]  ;;  %v1183_v30 = vld [vmem:[#allocation6 + $0x60] sm:$0xf] }
  0x1d   :  { %v1255_v27 = vld [vmem:[#allocation6 + $0xf0] sm:$0xf]  ;;  %177 = vmatpush.bf16.msra.mxu0 %v1100_v16  ;;  %v1192_v28 = vor.u32 %v1540_v26, %v1191_v25  ;;  %v1556_v29 = vld [vmem:[#allocation6 + $0xf4] sm:$0xf0]  ;;  %v1538_v31 = vld [vmem:[#allocation6 + $0x64] sm:$0xf0] }
  0x1e   :  { %190 = vmatpush.bf16.msra.mxu1 %v1104_v17  ;;  %203 = vmatpush.bf16.msra.mxu2 %v1108_v21  ;;  %v1256_v32 = vor.u32 %v1556_v29, %v1255_v27  ;;  %v1247_v33 = vld [vmem:[#allocation6 + $0xe0] sm:$0xf]  ;;  %v1554_v34 = vld [vmem:[#allocation6 + $0xe4] sm:$0xf0]  ;;  %v1319_v35 = vld [vmem:[#allocation6 + $0x170] sm:$0xf]  ;;  %v1184_v36 = vor.u32 %v1538_v31, %v1183_v30 }
  0x1f   :  { %216 = vmatpush.bf16.msra.mxu3 %v1112_v24  ;;  %v1572_v37 = vld [vmem:[#allocation6 + $0x174] sm:$0xf0]  ;;  %v1383_v38 = vld [vmem:[#allocation6 + $0x1f0] sm:$0xf]  ;;  %v1248_v40 = vor.u32 %v1554_v34, %v1247_v33  ;;  %v1311_v47 = vld [vmem:[#allocation6 + $0x160] sm:$0xf] }
  0x20   :  { %v1588_v39 = vld [vmem:[#allocation6 + $0x1f4] sm:$0xf0]  ;;  %1129 = vmatmul.msk.bf16.vlgmr.msra.gmra.mxu0 %vm166_vm0, %v107_v23  ;;  %v1320_v41 = vor.u32 %v1572_v37, %v1319_v35  ;;  %v1175_v43 = vld [vmem:[#allocation6 + $0x50] sm:$0xf]  ;;  %v1570_v48 = vld [vmem:[#allocation6 + $0x164] sm:$0xf0] }
  0x21   :  { %629 = vmatpush.bf16.msrb.mxu0 %v1192_v28  ;;  %v1384_v42 = vor.u32 %v1588_v39, %v1383_v38  ;;  %v1536_v44 = vld [vmem:[#allocation6 + $0x54] sm:$0xf0]  ;;  %v1239_v45 = vld [vmem:[#allocation6 + $0xd0] sm:$0xf]  ;;  %1130 = vmatmul.msk.bf16.vlgmr.msra.gmra.mxu1 %vm166_vm0, %v107_v23  ;;  %v1312_v49 = vor.u32 %v1570_v48, %v1311_v47  ;;  %v1375_v50 = vld [vmem:[#allocation6 + $0x1e0] sm:$0xf] }
  0x22   :  { %642 = vmatpush.bf16.msrb.mxu1 %v1256_v32  ;;  %1131 = vmatmul.msk.bf16.vlgmr.msra.gmra.mxu2 %vm166_vm0, %v107_v23  ;;  %v1552_v46 = vld [vmem:[#allocation6 + $0xd4] sm:$0xf0]  ;;  %v1586_v51 = vld [vmem:[#allocation6 + $0x1e4] sm:$0xf0]  ;;  %v1176_v52 = vor.u32 %v1536_v44, %v1175_v43  ;;  %v1167_v54 = vld [vmem:[#allocation6 + $0x40] sm:$0xf] }
  0x23   :  { %1132 = vmatmul.msk.bf16.vlgmr.msra.gmra.mxu3 %vm166_vm0, %v107_v23  ;;  %655 = vmatpush.bf16.msrb.mxu2 %v1320_v41  ;;  %v1376_v53 = vor.u32 %v1586_v51, %v1375_v50  ;;  %v1534_v55 = vld [vmem:[#allocation6 + $0x44] sm:$0xf0]  ;;  %v1240_v56 = vor.u32 %v1552_v46, %v1239_v45  ;;  %v1303_v57 = vld [vmem:[#allocation6 + $0x150] sm:$0xf]  ;;  %v1568_v58 = vld [vmem:[#allocation6 + $0x154] sm:$0xf0] }
  0x24   :  { %668 = vmatpush.bf16.msrb.mxu3 %v1384_v42  ;;  %v1367_v59 = vld [vmem:[#allocation6 + $0x1d0] sm:$0xf]  ;;  %v1231_v60 = vld [vmem:[#allocation6 + $0xc0] sm:$0xf]  ;;  %v1550_v61 = vld [vmem:[#allocation6 + $0xc4] sm:$0xf0]  ;;  %v1304_v63 = vor.u32 %v1568_v58, %v1303_v57  ;;  %v1168_v0 = vor.u32 %v1534_v55, %v1167_v54 }
  0x25   :  { %630 = vmatpush.bf16.msrb.mxu0 %v1184_v36  ;;  %v1584_v62 = vld [vmem:[#allocation6 + $0x1d4] sm:$0xf0]  ;;  %v1159_v2 = vld [vmem:[#allocation6 + $0x30] sm:$0xf]  ;;  %v1295_v3 = vld [vmem:[#allocation6 + $0x140] sm:$0xf]  ;;  %v1232_v5 = vor.u32 %v1550_v61, %v1231_v60 }
  0x26   :  { %643 = vmatpush.bf16.msrb.mxu1 %v1248_v40  ;;  %v1368_v1 = vor.u32 %v1584_v62, %v1367_v59  ;;  %v1566_v4 = vld [vmem:[#allocation6 + $0x144] sm:$0xf0]  ;;  %v1532_v6 = vld [vmem:[#allocation6 + $0x34] sm:$0xf0]  ;;  %v1359_v7 = vld [vmem:[#allocation6 + $0x1c0] sm:$0xf] }
  0x27   :  { %656 = vmatpush.bf16.msrb.mxu2 %v1312_v49  ;;  %v1582_v8 = vld [vmem:[#allocation6 + $0x1c4] sm:$0xf0]  ;;  %v1223_v9 = vld [vmem:[#allocation6 + $0xb0] sm:$0xf]  ;;  %v1548_v10 = vld [vmem:[#allocation6 + $0xb4] sm:$0xf0]  ;;  %v1296_v11 = vor.u32 %v1566_v4, %v1295_v3  ;;  %v1160_v12 = vor.u32 %v1532_v6, %v1159_v2 }
  0x28   :  { %669 = vmatpush.bf16.msrb.mxu3 %v1376_v53  ;;  %v1360_v13 = vor.u32 %v1582_v8, %v1359_v7  ;;  %v1151_v14 = vld [vmem:[#allocation6 + $0x20] sm:$0xf]  ;;  %v1287_v15 = vld [vmem:[#allocation6 + $0x130] sm:$0xf]  ;;  %v1564_v16 = vld [vmem:[#allocation6 + $0x134] sm:$0xf0]  ;;  %v1224_v17 = vor.u32 %v1548_v10, %v1223_v9 }
  0x29   :  { %631 = vmatpush.bf16.msrb.mxu0 %v1176_v52  ;;  %v1530_v18 = vld [vmem:[#allocation6 + $0x24] sm:$0xf0]  ;;  %v1351_v19 = vld [vmem:[#allocation6 + $0x1b0] sm:$0xf]  ;;  %v1580_v20 = vld [vmem:[#allocation6 + $0x1b4] sm:$0xf0]  ;;  %v1288_v23 = vor.u32 %v1564_v16, %v1287_v15 }
  0x2a   :  { %644 = vmatpush.bf16.msrb.mxu1 %v1240_v56  ;;  %v1215_v21 = vld [vmem:[#allocation6 + $0xa0] sm:$0xf]  ;;  %v1546_v22 = vld [vmem:[#allocation6 + $0xa4] sm:$0xf0]  ;;  %v1152_v24 = vor.u32 %v1530_v18, %v1151_v14  ;;  %v1352_v25 = vor.u32 %v1580_v20, %v1351_v19  ;;  %v1143_v26 = vld [vmem:[#allocation6 + $0x10] sm:$0xf] }
  0x2b   :  { %657 = vmatpush.bf16.msrb.mxu2 %v1304_v63  ;;  %v1279_v27 = vld [vmem:[#allocation6 + $0x120] sm:$0xf]  ;;  %v1562_v28 = vld [vmem:[#allocation6 + $0x124] sm:$0xf0]  ;;  %v1216_v29 = vor.u32 %v1546_v22, %v1215_v21  ;;  %v1528_v30 = vld [vmem:[#allocation6 + $0x14] sm:$0xf0] }
  0x2c   :  { %670 = vmatpush.bf16.msrb.mxu3 %v1368_v1  ;;  %v1343_v31 = vld [vmem:[#allocation6 + $0x1a0] sm:$0xf]  ;;  %v1578_v32 = vld [vmem:[#allocation6 + $0x1a4] sm:$0xf0]  ;;  %v1207_v33 = vld [vmem:[#allocation6 + $0x90] sm:$0xf]  ;;  %v1280_v35 = vor.u32 %v1562_v28, %v1279_v27  ;;  %v1144_v38 = vor.u32 %v1528_v30, %v1143_v26 }
  0x2d   :  { %632 = vmatpush.bf16.msrb.mxu0 %v1168_v0  ;;  %v1544_v34 = vld [vmem:[#allocation6 + $0x94] sm:$0xf0]  ;;  %v1135_v36 = vld [vmem:[#allocation6] sm:$0xf]  ;;  %v1526_v37 = vld [vmem:[#allocation6 + $0x4] sm:$0xf0]  ;;  %v1344_v39 = vor.u32 %v1578_v32, %v1343_v31 }
  0x2e   :  { %645 = vmatpush.bf16.msrb.mxu1 %v1232_v5  ;;  %v1199_v40 = vld [vmem:[#allocation6 + $0x80] sm:$0xf]  ;;  %v1542_v41 = vld [vmem:[#allocation6 + $0x84] sm:$0xf0]  ;;  %v1271_v42 = vld [vmem:[#allocation6 + $0x110] sm:$0xf]  ;;  %v1208_v44 = vor.u32 %v1544_v34, %v1207_v33  ;;  %v1136_v53 = vor.u32 %v1526_v37, %v1135_v36 }
  0x2f   :  { %658 = vmatpush.bf16.msrb.mxu2 %v1296_v11  ;;  %v1560_v43 = vld [vmem:[#allocation6 + $0x114] sm:$0xf0]  ;;  %v1539_v45 = vld [vmem:[#allocation6 + $0x74] sm:$0xf]  ;;  %v1335_v46 = vld [vmem:[#allocation6 + $0x190] sm:$0xf]  ;;  %v1200_v58 = vor.u32 %v1542_v41, %v1199_v40 }
  0x30   :  { %671 = vmatpush.bf16.msrb.mxu3 %v1360_v13  ;;  %v1576_v47 = vld [vmem:[#allocation6 + $0x194] sm:$0xf0]  ;;  %v1193_v48 = vld [vmem:[#allocation6 + $0x78] sm:$0xf0]  ;;  %v1555_v49 = vld [vmem:[#allocation6 + $0xf4] sm:$0xf]  ;;  %v1272_v51 = vor.u32 %v1560_v43, %v1271_v42 }
  0x31   :  { %633 = vmatpush.bf16.msrb.mxu0 %v1160_v12  ;;  %v1257_v50 = vld [vmem:[#allocation6 + $0xf8] sm:$0xf0]  ;;  %v1263_v52 = vld [vmem:[#allocation6 + $0x100] sm:$0xf]  ;;  %v1336_v54 = vor.u32 %v1576_v47, %v1335_v46  ;;  %v1537_v55 = vld [vmem:[#allocation6 + $0x64] sm:$0xf]  ;;  %v1196_v59 = vor.u32 %v1539_v45, %v1193_v48 }
  0x32   :  { %646 = vmatpush.bf16.msrb.mxu1 %v1224_v17  ;;  %v1558_v56 = vld [vmem:[#allocation6 + $0x104] sm:$0xf0]  ;;  %v1327_v57 = vld [vmem:[#allocation6 + $0x180] sm:$0xf]  ;;  %v1571_v61 = vld [vmem:[#allocation6 + $0x174] sm:$0xf]  ;;  %v1260_v63 = vor.u32 %v1555_v49, %v1257_v50 }
  0x33   :  { %659 = vmatpush.bf16.msrb.mxu2 %v1288_v23  ;;  %v1574_v60 = vld [vmem:[#allocation6 + $0x184] sm:$0xf0]  ;;  %v1321_v62 = vld [vmem:[#allocation6 + $0x178] sm:$0xf0]  ;;  %v1185_v0 = vld [vmem:[#allocation6 + $0x68] sm:$0xf0]  ;;  %v1264_v5 = vor.u32 %v1558_v56, %v1263_v52 }
  0x34   :  { %672 = vmatpush.bf16.msrb.mxu3 %v1352_v25  ;;  %v1587_v1 = vld [vmem:[#allocation6 + $0x1f4] sm:$0xf]  ;;  %v1385_v2 = vld [vmem:[#allocation6 + $0x1f8] sm:$0xf0]  ;;  %v1553_v3 = vld [vmem:[#allocation6 + $0xe4] sm:$0xf]  ;;  %v1328_v6 = vor.u32 %v1574_v60, %v1327_v57  ;;  %v1324_v7 = vor.u32 %v1571_v61, %v1321_v62  ;;  %v1188_v8 = vor.u32 %v1537_v55, %v1185_v0 }
  0x35   :  { %634 = vmatpush.bf16.msrb.mxu0 %v1152_v24  ;;  %v1249_v4 = vld [vmem:[#allocation6 + $0xe8] sm:$0xf0]  ;;  %v1388_v9 = vor.u32 %v1587_v1, %v1385_v2  ;;  %v1535_v11 = vld [vmem:[#allocation6 + $0x54] sm:$0xf]  ;;  %v1177_v12 = vld [vmem:[#allocation6 + $0x58] sm:$0xf0] }
  0x36   :  { %647 = vmatpush.bf16.msrb.mxu1 %v1216_v29  ;;  %v1252_v10 = vor.u32 %v1553_v3, %v1249_v4  ;;  %v1551_v13 = vld [vmem:[#allocation6 + $0xd4] sm:$0xf]  ;;  %v1180_v14 = vor.u32 %v1535_v11, %v1177_v12  ;;  %v1241_v15 = vld [vmem:[#allocation6 + $0xd8] sm:$0xf0]  ;;  %v1569_v17 = vld [vmem:[#allocation6 + $0x164] sm:$0xf] }
  0x37   :  { %660 = vmatpush.bf16.msrb.mxu2 %v1280_v35  ;;  %v1244_v16 = vor.u32 %v1551_v13, %v1241_v15  ;;  %v1313_v18 = vld [vmem:[#allocation6 + $0x168] sm:$0xf0]  ;;  %v1585_v19 = vld [vmem:[#allocation6 + $0x1e4] sm:$0xf]  ;;  %v1567_v29 = vld [vmem:[#allocation6 + $0x154] sm:$0xf] }
  0x38   :  { %673 = vmatpush.bf16.msrb.mxu3 %v1344_v39  ;;  %v1316_v20 = vor.u32 %v1569_v17, %v1313_v18  ;;  %v1377_v21 = vld [vmem:[#allocation6 + $0x1e8] sm:$0xf0]  ;;  %v1533_v23 = vld [vmem:[#allocation6 + $0x44] sm:$0xf]  ;;  %v1305_v30 = vld [vmem:[#allocation6 + $0x158] sm:$0xf0] }
  0x39   :  { %635 = vmatpush.bf16.msrb.mxu0 %v1144_v38  ;;  %v1380_v22 = vor.u32 %v1585_v19, %v1377_v21  ;;  %v1169_v24 = vld [vmem:[#allocation6 + $0x48] sm:$0xf0]  ;;  %v1549_v25 = vld [vmem:[#allocation6 + $0xc4] sm:$0xf]  ;;  %v1583_v31 = vld [vmem:[#allocation6 + $0x1d4] sm:$0xf]  ;;  %v1308_v32 = vor.u32 %v1567_v29, %v1305_v30  ;;  %v226_v29 = vstv %s103_s1 }
  0x3a   :  { %648 = vmatpush.bf16.msrb.mxu1 %v1208_v44  ;;  %v1172_v26 = vor.u32 %v1533_v23, %v1169_v24  ;;  %v1233_v27 = vld [vmem:[#allocation6 + $0xc8] sm:$0xf0]  ;;  %v1369_v33 = vld [vmem:[#allocation6 + $0x1d8] sm:$0xf0]  ;;  %v1531_v35 = vld [vmem:[#allocation6 + $0x34] sm:$0xf] }
  0x3b   :  { %661 = vmatpush.bf16.msrb.mxu2 %v1272_v51  ;;  %v1236_v28 = vor.u32 %v1549_v25, %v1233_v27  ;;  %v1372_v34 = vor.u32 %v1583_v31, %v1369_v33  ;;  %v1161_v36 = vld [vmem:[#allocation6 + $0x38] sm:$0xf0]  ;;  %v1547_v37 = vld [vmem:[#allocation6 + $0xb4] sm:$0xf]  ;;  %v1565_v41 = vld [vmem:[#allocation6 + $0x144] sm:$0xf] }
  0x3c   :  { %674 = vmatpush.bf16.msrb.mxu3 %v1336_v54  ;;  %v1164_v38 = vor.u32 %v1531_v35, %v1161_v36  ;;  %v1225_v39 = vld [vmem:[#allocation6 + $0xb8] sm:$0xf0]  ;;  %v1297_v42 = vld [vmem:[#allocation6 + $0x148] sm:$0xf0]  ;;  %v1581_v43 = vld [vmem:[#allocation6 + $0x1c4] sm:$0xf] }
  0x3d   :  { %636 = vmatpush.bf16.msrb.mxu0 %v1136_v53  ;;  %v1228_v40 = vor.u32 %v1547_v37, %v1225_v39  ;;  %v1300_v44 = vor.u32 %v1565_v41, %v1297_v42  ;;  %v1361_v45 = vld [vmem:[#allocation6 + $0x1c8] sm:$0xf0]  ;;  %v1529_v46 = vld [vmem:[#allocation6 + $0x24] sm:$0xf]  ;;  %v1563_v53 = vld [vmem:[#allocation6 + $0x134] sm:$0xf] }
  0x3e   :  { %649 = vmatpush.bf16.msrb.mxu1 %v1200_v58  ;;  %v1153_v47 = vld [vmem:[#allocation6 + $0x28] sm:$0xf0]  ;;  %v1364_v48 = vor.u32 %v1581_v43, %v1361_v45  ;;  %v1545_v50 = vld [vmem:[#allocation6 + $0xa4] sm:$0xf]  ;;  %v1289_v54 = vld [vmem:[#allocation6 + $0x138] sm:$0xf0] }
  0x3f   :  { %662 = vmatpush.bf16.msrb.mxu2 %v1264_v5  ;;  %v1156_v49 = vor.u32 %v1529_v46, %v1153_v47  ;;  %v1217_v51 = vld [vmem:[#allocation6 + $0xa8] sm:$0xf0]  ;;  %v1579_v55 = vld [vmem:[#allocation6 + $0x1b4] sm:$0xf]  ;;  %v1292_v56 = vor.u32 %v1563_v53, %v1289_v54  ;;  %v1353_v57 = vld [vmem:[#allocation6 + $0x1b8] sm:$0xf0] }
  0x40   :  { %675 = vmatpush.bf16.msrb.mxu3 %v1328_v6  ;;  %v1220_v52 = vor.u32 %v1545_v50, %v1217_v51  ;;  %v1356_v58 = vor.u32 %v1579_v55, %v1353_v57  ;;  %v1145_v60 = vld [vmem:[#allocation6 + $0x18] sm:$0xf0]  ;;  %v1543_v61 = vld [vmem:[#allocation6 + $0x94] sm:$0xf]  ;;  %v1561_v0 = vld [vmem:[#allocation6 + $0x124] sm:$0xf] }
  0x41   :  { %681 = vmatpush.bf16.msra.mxu0 %v1196_v59  ;;  %v1527_v59 = vld [vmem:[#allocation6 + $0x14] sm:$0xf]  ;;  %v1281_v1 = vld [vmem:[#allocation6 + $0x128] sm:$0xf0]  ;;  %v1577_v4 = vld [vmem:[#allocation6 + $0x1a4] sm:$0xf] }
  0x42   :  { %694 = vmatpush.bf16.msra.mxu1 %v1260_v63  ;;  %v1148_v62 = vor.u32 %v1527_v59, %v1145_v60  ;;  %v1209_v63 = vld [vmem:[#allocation6 + $0x98] sm:$0xf0]  ;;  %v1284_v3 = vor.u32 %v1561_v0, %v1281_v1  ;;  %v1345_v5 = vld [vmem:[#allocation6 + $0x1a8] sm:$0xf0]  ;;  %v1525_v6 = vld [vmem:[#allocation6 + $0x4] sm:$0xf] }
  0x43   :  { %707 = vmatpush.bf16.msra.mxu2 %v1324_v7  ;;  %v1212_v2 = vor.u32 %v1543_v61, %v1209_v63  ;;  %v1348_v7 = vor.u32 %v1577_v4, %v1345_v5  ;;  %v1559_v13 = vld [vmem:[#allocation6 + $0x114] sm:$0xf]  ;;  %v1337_v17 = vld [vmem:[#allocation6 + $0x198] sm:$0xf0]  ;;  %v1557_v19 = vld [vmem:[#allocation6 + $0x104] sm:$0xf] }
  0x44   :  { %720 = vmatpush.bf16.msra.mxu3 %v1388_v9  ;;  %v1541_v9 = vld [vmem:[#allocation6 + $0x84] sm:$0xf]  ;;  %v1575_v15 = vld [vmem:[#allocation6 + $0x194] sm:$0xf]  ;;  %v1329_v24 = vld [vmem:[#allocation6 + $0x188] sm:$0xf0] }
  0x45   :  { %682 = vmatpush.bf16.msra.mxu0 %v1188_v8  ;;  %v1137_v8 = vld [vmem:[#allocation6 + $0x8] sm:$0xf0]  ;;  %v1340_v18 = vor.u32 %v1575_v15, %v1337_v17  ;;  %v1573_v21 = vld [vmem:[#allocation6 + $0x184] sm:$0xf]  ;;  %v1604_v59 = vld [vmem:[#allocation7 + $0x78] sm:$0xff]  ;;  %s1896_s17 = sld [smem:[#allocation2 + $0x1]] }
  0x46   :  { %695 = vmatpush.bf16.msra.mxu1 %v1252_v10  ;;  %v1201_v10 = vld [vmem:[#allocation6 + $0x88] sm:$0xf0]  ;;  %v1140_v11 = vor.u32 %v1525_v6, %v1137_v8  ;;  %v1332_v25 = vor.u32 %v1573_v21, %v1329_v24  ;;  %v1592_v60 = vld [vmem:[#allocation7 + $0x18] sm:$0xff]  ;;  %v1591_v61 = vld [vmem:[#allocation7 + $0x10] sm:$0xff]  ;;  %s1095_s8 = sld [smem:[#allocation2 + $0x2]]  ;;  %vm1073_vm9 = vcmask 60416  }
  0x47   :  { %708 = vmatpush.bf16.msra.mxu2 %v1316_v20  ;;  %v1204_v12 = vor.u32 %v1541_v9, %v1201_v10  ;;  %v1265_v20 = vld [vmem:[#allocation6 + $0x108] sm:$0xf0]  ;;  %v1589_v1 = vld [vmem:[#allocation7] sm:$0xff]  ;;  %v1599_v4 = vld [vmem:[#allocation7 + $0x50] sm:$0xff] }
  0x48   :  { %721 = vmatpush.bf16.msra.mxu3 %v1380_v22  ;;  %v116_v22 = vld [vmem:[%s1938_s3] sm:$0xf]  ;;  %v1268_v23 = vor.u32 %v1557_v19, %v1265_v20  ;;  %v1594_v54 = vld [vmem:[#allocation7 + $0x28] sm:$0xff]  ;;  %v1611_v15 = vld [vmem:[#allocation9 + $0x30] sm:$0xff] }
  0x49   :  { %683 = vmatpush.bf16.msra.mxu0 %v1180_v14  ;;  %v1273_v14 = vld [vmem:[#allocation6 + $0x118] sm:$0xf0]  ;;  %v119_v27 = vperm.slane %v116_v22, 1  ;;  %v120_v35 = vperm.slane %v116_v22, 2  ;;  %v121_v36 = vperm.slane %v116_v22, 3  ;;  %v1590_v63 = vld [vmem:[#allocation7 + $0x8] sm:$0xff] }
  0x4a   :  { %696 = vmatpush.bf16.msra.mxu1 %v1244_v16  ;;  %v1276_v16 = vor.u32 %v1559_v13, %v1273_v14  ;;  %v1602_v0 = vld [vmem:[#allocation7 + $0x68] sm:$0xff]  ;;  %v1597_v9 = vld [vmem:[#allocation7 + $0x40] sm:$0xff] }
  0x4b   :  { %709 = vmatpush.bf16.msra.mxu2 %v1308_v32  ;;  %v1598_v5 = vld [vmem:[#allocation7 + $0x48] sm:$0xff]  ;;  %v735_v20 = vstv %s1896_s17 }
  0x4c   :  { %722 = vmatpush.bf16.msra.mxu3 %v1372_v34 }
  0x4d   :  { %684 = vmatpush.bf16.msra.mxu0 %v1172_v26  ;;  %v118_v26 = vperm.slane %v116_v22, 0 }
  0x4e   :  { %697 = vmatpush.bf16.msra.mxu1 %v1236_v28 }
  0x4f   :  { %710 = vmatpush.bf16.msra.mxu2 %v1300_v44 }
  0x50   :  { %723 = vmatpush.bf16.msra.mxu3 %v1364_v48  ;;  %v1595_v48 = vld [vmem:[#allocation7 + $0x30] sm:$0xff] }
  0x51   :  { %685 = vmatpush.bf16.msra.mxu0 %v1164_v38  ;;  %v1596_v38 = vld [vmem:[#allocation7 + $0x38] sm:$0xff] }
  0x52   :  { %698 = vmatpush.bf16.msra.mxu1 %v1228_v40 }
  0x53   :  { %711 = vmatpush.bf16.msra.mxu2 %v1292_v56 }
  0x54   :  { %724 = vmatpush.bf16.msra.mxu3 %v1356_v58  ;;  %v1593_v58 = vld [vmem:[#allocation7 + $0x20] sm:$0xff] }
  0x55   :  { %686 = vmatpush.bf16.msra.mxu0 %v1156_v49 }
  0x56   :  { %699 = vmatpush.bf16.msra.mxu1 %v1220_v52 }
  0x57   :  { %712 = vmatpush.bf16.msra.mxu2 %v1284_v3  ;;  %v1600_v3 = vld [vmem:[#allocation7 + $0x58] sm:$0xff] }
  0x58   :  { %725 = vmatpush.bf16.msra.mxu3 %v1348_v7  ;;  %v303_v7 = vld [vmem:[%s1940_s5] sm:$0x3] }
  0x59   :  { %687 = vmatpush.bf16.msra.mxu0 %v1148_v62  ;;  %v1603_v62 = vld [vmem:[#allocation7 + $0x70] sm:$0xff]  ;;  %v305_v10 = vperm.slane %v303_v7, 0 }
  0x5a   :  { %700 = vmatpush.bf16.msra.mxu1 %v1212_v2  ;;  %v1601_v2 = vld [vmem:[#allocation7 + $0x60] sm:$0xff] }
  0x5b   :  { %713 = vmatpush.bf16.msra.mxu2 %v1276_v16 }
  0x5c   :  { %726 = vmatpush.bf16.msra.mxu3 %v1340_v18 }
  0x5d   :  { %688 = vmatpush.bf16.msra.mxu0 %v1140_v11  ;;  %v1612_v11 = vld [vmem:[#allocation9 + $0x38] sm:$0xff] }
  0x5e   :  { %701 = vmatpush.bf16.msra.mxu1 %v1204_v12 }
  0x5f   :  { %714 = vmatpush.bf16.msra.mxu2 %v1268_v23 }
  0x60   :  { %727 = vmatpush.bf16.msra.mxu3 %v1332_v25 }
  0x9d   :  { %v179_v28 = vpop.f32.mrf.mxu0 }
  0x9e   :  { %v180_v30 = vadd.f32 %v179_v28, %v118_v26  ;;  %v192_v31 = vpop.f32.mrf.mxu1  ;;  %v306_v26 = vperm.slane %v303_v7, 1 }
  0x9f   :  { %v193_v32 = vadd.f32 %v192_v31, %v119_v27 }
  0xa0   :  { %vm222_vm1 = vcmp.ge.f32.partialorder %v180_v30, 0.0  ;;  %v227_v33 = vmul.f32 %v226_v29, %v180_v30 }
  0xa1   :  { %vm223_vm2 = vcmp.ge.f32.partialorder %v193_v32, 0.0  ;;  %v228_v34 = vmul.f32 %v226_v29, %v193_v32 }
  0xa2   :  { %v231_v37 = vsel %vm222_vm1, %v180_v30, %v227_v33 }
  0xa3   :  { %v235_v39 = vpack.c.bf16 %v231_v37, %v231_v37  ;;  %v232_v40 = vsel %vm223_vm2, %v193_v32, %v228_v34 }
  0xa4   :  { %v236_v42 = vpack.c.bf16 %v232_v40, %v232_v40 }
  0xa5   :  { %v205_v41 = vpop.f32.mrf.mxu2  ;;  %v181_v45 = vpop.f32.mrf.mxu0  ;;  %637 = vmatmul.bf16.vlgmr.msrb.gmra.mxu0 %v235_v39 }
  0xa6   :  { %v206_v43 = vadd.f32 %v205_v41, %v120_v35  ;;  %v218_v44 = vpop.f32.mrf.mxu3  ;;  %650 = vmatmul.bf16.vlgmr.msrb.gmra.mxu1 %v236_v42  ;;  %v194_v47 = vpop.f32.mrf.mxu1  ;;  %874 = vmatpush.bf16.msrb.mxu0 %v1596_v38  ;;  %v1608_v45 = vld [vmem:[#allocation9 + $0x18] sm:$0xff] }
  0xa7   :  { %v219_v46 = vadd.f32 %v218_v44, %v121_v36  ;;  %887 = vmatpush.bf16.msrb.mxu1 %v1604_v59  ;;  %v1609_v44 = vld [vmem:[#allocation9 + $0x20] sm:$0xff]  ;;  %v1606_v47 = vld [vmem:[#allocation9 + $0x8] sm:$0xff] }
  0xa8   :  { %vm224_vm3 = vcmp.ge.f32.partialorder %v206_v43, 0.0  ;;  %v229_v49 = vmul.f32 %v226_v29, %v206_v43 }
  0xa9   :  { %vm225_vm4 = vcmp.ge.f32.partialorder %v219_v46, 0.0  ;;  %v230_v50 = vmul.f32 %v226_v29, %v219_v46 }
  0xaa   :  { %v233_v51 = vsel %vm224_vm3, %v206_v43, %v229_v49  ;;  %875 = vmatpush.bf16.msrb.mxu0 %v1595_v48  ;;  %v1610_v43 = vld [vmem:[#allocation9 + $0x28] sm:$0xff]  ;;  %v1605_v48 = vld [vmem:[#allocation9] sm:$0xff]  ;;  %v1620_v49 = vld [vmem:[%s1945_s10 + $0x38] sm:$0xff] }
  0xab   :  { %v237_v52 = vpack.c.bf16 %v233_v51, %v233_v51  ;;  %v234_v53 = vsel %vm225_vm4, %v219_v46, %v230_v50  ;;  %888 = vmatpush.bf16.msrb.mxu1 %v1603_v62  ;;  %v1607_v46 = vld [vmem:[#allocation9 + $0x10] sm:$0xff]  ;;  %v1618_v51 = vld [vmem:[%s1945_s10 + $0x28] sm:$0xff] }
  0xac   :  { %v238_v55 = vpack.c.bf16 %v234_v53, %v234_v53  ;;  %v1619_v50 = vld [vmem:[%s1945_s10 + $0x30] sm:$0xff]  ;;  %v1617_v53 = vld [vmem:[%s1945_s10 + $0x20] sm:$0xff] }
  0xad   :  { %v207_v56 = vpop.f32.mrf.mxu2  ;;  %663 = vmatmul.bf16.vlgmr.msrb.gmra.mxu2 %v237_v52 }
  0xae   :  { %v220_v57 = vpop.f32.mrf.mxu3  ;;  %676 = vmatmul.bf16.vlgmr.msrb.gmra.mxu3 %v238_v55  ;;  %876 = vmatpush.bf16.msrb.mxu0 %v1594_v54  ;;  %v1616_v54 = vld [vmem:[%s1945_s10 + $0x18] sm:$0xff]  ;;  %v1615_v56 = vld [vmem:[%s1945_s10 + $0x10] sm:$0xff] }
  0xaf   :  { %889 = vmatpush.bf16.msrb.mxu1 %v1602_v0  ;;  %973 = vmatpush.bf16.msrb.mxu2 %v1612_v11  ;;  %v1630_v57 = vld [vmem:[%s1942_s7] ss:$0 sm:$0xff]  ;;  %s1096_s7 = sld [smem:[#allocation2 + $0x3]] }
  0xb0   :  { %1059 = vmatpush.bf16.msrb.mxu3 %v1620_v49 }
  0xb2   :  { %877 = vmatpush.bf16.msrb.mxu0 %v1593_v58 }
  0xb3   :  { %890 = vmatpush.bf16.msrb.mxu1 %v1601_v2  ;;  %974 = vmatpush.bf16.msrb.mxu2 %v1611_v15  ;;  %v1614_v2 = vld [vmem:[%s1945_s10 + $0x8] sm:$0xff] }
  0xb4   :  { %1060 = vmatpush.bf16.msrb.mxu3 %v1619_v50 }
  0xb5   :  { %689 = vmatmul.bf16.vlgmr.msra.gmra.mxu0 %v235_v39 }
  0xb6   :  { %702 = vmatmul.bf16.vlgmr.msra.gmra.mxu1 %v236_v42  ;;  %878 = vmatpush.bf16.msrb.mxu0 %v1592_v60  ;;  %v901_v60 = vstv %s1095_s8 }
  0xb7   :  { %891 = vmatpush.bf16.msrb.mxu1 %v1600_v3  ;;  %975 = vmatpush.bf16.msrb.mxu2 %v1610_v43  ;;  %v1613_v3 = vld [vmem:[%s1945_s10] sm:$0xff]  ;;  %s1757_s10 = smov [#allocation10]  }
  0xb8   :  { %1061 = vmatpush.bf16.msrb.mxu3 %v1618_v51  ;;  %s1080_s3 = sshll.u32 %s1757_s10, 4  ;;  %s1081_s3 = int_to_ptr.vmem [resolvable:$true] %s1080_s3 }
  0xba   :  { %879 = vmatpush.bf16.msrb.mxu0 %v1591_v61 }
  0xbb   :  { %892 = vmatpush.bf16.msrb.mxu1 %v1599_v4  ;;  %976 = vmatpush.bf16.msrb.mxu2 %v1609_v44  ;;  %v1631_v4 = vld [vmem:[%s1944_s9] ss:$0 sm:$0xff]  ;;  %s1082_s9 = sshll.u32 %s1947_s12, 4  ;;  %s1083_s9 = int_to_ptr.hbm [resolvable:$true] %s1082_s9 }
  0xbc   :  { %1062 = vmatpush.bf16.msrb.mxu3 %v1617_v53 }
  0xbd   :  { %715 = vmatmul.bf16.vlgmr.msra.gmra.mxu2 %v237_v52 }
  0xbe   :  { %728 = vmatmul.bf16.vlgmr.msra.gmra.mxu3 %v238_v55  ;;  %880 = vmatpush.bf16.msrb.mxu0 %v1590_v63 }
  0xbf   :  { %893 = vmatpush.bf16.msrb.mxu1 %v1598_v5  ;;  %977 = vmatpush.bf16.msrb.mxu2 %v1608_v45 }
  0xc0   :  { %1063 = vmatpush.bf16.msrb.mxu3 %v1616_v54 }
  0xc2   :  { %881 = vmatpush.bf16.msrb.mxu0 %v1589_v1 }
  0xc3   :  { %894 = vmatpush.bf16.msrb.mxu1 %v1597_v9  ;;  %978 = vmatpush.bf16.msrb.mxu2 %v1607_v46 }
  0xc4   :  { %1064 = vmatpush.bf16.msrb.mxu3 %v1615_v56 }
  0xc7   :  { %979 = vmatpush.bf16.msrb.mxu2 %v1606_v47 }
  0xc8   :  { %1065 = vmatpush.bf16.msrb.mxu3 %v1614_v2 }
  0xcb   :  { %980 = vmatpush.bf16.msrb.mxu2 %v1605_v48 }
  0xcc   :  { %1066 = vmatpush.bf16.msrb.mxu3 %v1613_v3 }
 0x122   :  { %v638_v6 = vpop.f32.mrf.mxu0 }
 0x123   :  { %v651_v8 = vpop.f32.mrf.mxu1  ;;  %v639_v12 = vadd.f32 %v638_v6, %v305_v10  ;;  %v987_v6 = vstv %s1096_s7 }
 0x125   :  { %v652_v16 = vadd.f32 %v651_v8, %v639_v12  ;;  %v1632_v12 = vld [vmem:[%s1946_s11] ss:$0 sm:$0xff] }
 0x12a   :  { %v640_v13 = vpop.f32.mrf.mxu0 }
 0x12b   :  { %v653_v14 = vpop.f32.mrf.mxu1 }
 0x130   :  { %v664_v17 = vpop.f32.mrf.mxu2 }
 0x131   :  { %v665_v18 = vadd.f32 %v664_v17, %v652_v16  ;;  %v677_v19 = vpop.f32.mrf.mxu3 }
 0x132   :  { %v690_v22 = vpop.f32.mrf.mxu0 }
 0x133   :  { %v678_v21 = vadd.f32 %v677_v19, %v665_v18  ;;  %v703_v23 = vpop.f32.mrf.mxu1  ;;  %v691_v30 = vadd.f32 %v690_v22, %v306_v26 }
 0x135   :  { %vm733_vm5 = vcmp.ge.f32.partialorder %v678_v21, 0.0  ;;  %v736_v24 = vmul.f32 %v735_v20, %v678_v21  ;;  %v704_v33 = vadd.f32 %v703_v23, %v691_v30 }
 0x137   :  { %v738_v25 = vsel %vm733_vm5, %v678_v21, %v736_v24 }
 0x138   :  { %v740_v27 = vpack.c.bf16 %v738_v25, %v738_v25  ;;  %v666_v28 = vpop.f32.mrf.mxu2 }
 0x139   :  { %v679_v29 = vpop.f32.mrf.mxu3 }
 0x13a   :  { %882 = vmatmul.bf16.vlgmr.msrb.gmra.mxu0 %v740_v27  ;;  %v692_v31 = vpop.f32.mrf.mxu0 }
 0x13b   :  { %v705_v32 = vpop.f32.mrf.mxu1 }
 0x140   :  { %v716_v34 = vpop.f32.mrf.mxu2 }
 0x141   :  { %v717_v35 = vadd.f32 %v716_v34, %v704_v33  ;;  %v729_v36 = vpop.f32.mrf.mxu3 }
 0x143   :  { %v730_v37 = vadd.f32 %v729_v36, %v717_v35 }
 0x145   :  { %vm734_vm6 = vcmp.ge.f32.partialorder %v730_v37, 0.0  ;;  %v737_v38 = vmul.f32 %v735_v20, %v730_v37 }
 0x147   :  { %v739_v39 = vsel %vm734_vm6, %v730_v37, %v737_v38 }
 0x148   :  { %v741_v40 = vpack.c.bf16 %v739_v39, %v739_v39  ;;  %v718_v41 = vpop.f32.mrf.mxu2 }
 0x149   :  { %v731_v42 = vpop.f32.mrf.mxu3 }
 0x14a   :  { %895 = vmatmul.bf16.vlgmr.msrb.gmra.mxu1 %v741_v40 }
 0x1b7   :  { %v883_v52 = vpop.f32.mrf.mxu0 }
 0x1b8   :  { %v884_v58 = vadd.f32 %v1630_v57, %v883_v52 }
 0x1bf   :  { %v885_v55 = vpop.f32.mrf.mxu0 }
 0x1c7   :  { %v896_v59 = vpop.f32.mrf.mxu1 }
 0x1c8   :  { %v897_v61 = vadd.f32 %v896_v59, %v884_v58 }
 0x1ca   :  { %vm900_vm7 = vcmp.ge.f32.partialorder %v897_v61, 0.0  ;;  %v902_v62 = vmul.f32 %v901_v60, %v897_v61 }
 0x1cc   :  { %v903_v63 = vsel %vm900_vm7, %v897_v61, %v902_v62 }
 0x1cd   :  { %v904_v0 = vpack.c.bf16 %v903_v63, %v903_v63 }
 0x1cf   :  { %v898_v1 = vpop.f32.mrf.mxu1  ;;  %981 = vmatmul.bf16.vlgmr.msrb.gmra.mxu2 %v904_v0 }
 0x252   :  { %v982_v5 = vpop.f32.mrf.mxu2 }
 0x253   :  { %v983_v7 = vadd.f32 %v1631_v4, %v982_v5 }
 0x255   :  { %vm986_vm8 = vcmp.ge.f32.partialorder %v983_v7, 0.0  ;;  %v988_v8 = vmul.f32 %v987_v6, %v983_v7 }
 0x257   :  { %v989_v9 = vsel %vm986_vm8, %v983_v7, %v988_v8 }
 0x258   :  { %v990_v10 = vpack.c.bf16 %v989_v9, %v989_v9 }
 0x25a   :  { %v984_v11 = vpop.f32.mrf.mxu2  ;;  %1067 = vmatmul.bf16.vlgmr.msrb.gmra.mxu3 %v990_v10 }
 0x2dd   :  { %v1068_v13 = vpop.f32.mrf.mxu3 }
 0x2de   :  { %v1069_v14 = vadd.f32 %v1632_v12, %v1068_v13 }
 0x2e0   :  { %v1072_v15 = vpack.c.bf16 %v1069_v14, %v1069_v14 }
 0x2e2   :  { %1074 = vst.msk [vmem:[#allocation10] sm:$0xf] %vm1073_vm9, %v1072_v15 }
 0x2e3   :  { %1085 = dma.vmem_to_hbm [thread:$0]  %s1081_s3, 64, %s1083_s9, [#allocation4]  }
 0x2e5   :  { %v1070_v16 = vpop.f32.mrf.mxu3 }
 0x2e6   :  { %1747 = dma.done.wait [#allocation4], 64  }
 0x2e7   :  { %1748 = vsyncadd [#allocation4], 4294967232 }
 0x2e8   :  { %1090 = vsyncpa [#allocation3], 1 }
 0x2e9   :  { %1091 = vsyncpa [#allocation8], 1 }
 0x2ea   :  { %1092 = vsyncpa [#allocation4], 1 }
 0x2eb   :  { %1093 = vsyncpa [#allocation5], 1 }

</bundles_post_ra>
